<compile_context>
chip_gen: v7x
topology: tpu7x:2x2x1
jax: 0.10.0
libtpu: 0.0.40
codegen_flags: <defaults>
</compile_context>

<pallas_src>
import functools

import jax
import jax.numpy as jnp
from jax import lax
from jax.experimental import pallas as pl
from jax.experimental.pallas import tpu as pltpu

_NEG_LARGE = -3.0e38
_EPS = 1e-5


def _round_up(x, m):
    return (x + m - 1) // m * m


def _vmem_capacity_bytes():
    try:
        return int(pltpu.get_tpu_info().vmem_capacity_bytes)
    except Exception:  # pragma: no cover - conservative fallback (v7x-sized)
        return 64 * 1024 * 1024


# ----------------------------------------------------------------------------
# Path A: whole-sample-resident fused kernel (one batch element per grid step)
# ----------------------------------------------------------------------------
def _make_resident_kernel(hw_valid, hw_pad):
    n_pad = hw_pad - hw_valid
    inv_hw = 1.0 / float(hw_valid)
    inv_den = 1.0 / float(max(hw_valid - 1, 1))

    def kernel(feat_ref, mask_ref, w1a_ref, w1b_ref, b1_ref, w2_ref, b2_ref,
               out_ref):
        x = feat_ref[...]                      # (C_pad, HW_pad), channels on sublanes
        m = mask_ref[...]                      # (1, HW_pad), already rounded {0,1}

        # ---- per-channel statistics (single read of x, VMEM resident) ------
        ssum = jnp.sum(x, axis=1, keepdims=True)            # (C, 1)
        mu = ssum * inv_hw

        if n_pad:
            lane = lax.broadcasted_iota(jnp.int32, (1, hw_pad), 1)
            valid = lane < hw_valid
            mx = jnp.max(jnp.where(valid, x, _NEG_LARGE), axis=1, keepdims=True)
        else:
            mx = jnp.max(x, axis=1, keepdims=True)

        # Centered variance (robust vs E[x^2]-mu^2 cancellation); the zero-padded
        # lanes contribute exactly n_pad * mu^2, subtracted analytically.
        xc = x - mu
        css = jnp.sum(xc * xc, axis=1, keepdims=True)
        if n_pad:
            css = css - float(n_pad) * mu * mu
        var = jnp.maximum(css * inv_den, 0.0)

        # ---- the three GlobalAttentionModules: per-channel scales ----------
        # Tiny FCs done as exact-f32 broadcast + reduce on the VPU/XLU.
        def channel_scale(i):
            t = w1a_ref[i] * mu + w1b_ref[i] * mx                       # (C, Hp)
            h = jnp.maximum(jnp.sum(t, axis=0, keepdims=True)
                            + b1_ref[i], 0.0)                           # (1, Hp)
            z = jnp.sum(w2_ref[i] * h, axis=1, keepdims=True) + b2_ref[i]
            return jax.nn.sigmoid(z)                                    # (C, 1)

        s_bg = channel_scale(0)
        s_sel = channel_scale(1)
        s_sp = channel_scale(2)

        # ---- analytic AdaIN statistics + fused blend ------------------------
        std_s = jnp.sqrt(s_bg * s_bg * var + _EPS)
        rstd_c = lax.rsqrt(s_sp * s_sp * var + _EPS)
        coeff = s_sp * rstd_c * std_s

        a = s_sel - s_bg + coeff
        b = mu * (s_bg - coeff)
        out_ref[...] = (x * s_bg + m * (x * a + b)).astype(out_ref.dtype)

    return kernel


# ----------------------------------------------------------------------------
# Path B phase 1: per-channel sum / sumsq / max accumulated over HW tiles
# ----------------------------------------------------------------------------
def _make_stats_kernel(hw_valid, tile, padded):
    def kernel(feat_ref, sum_ref, ssq_ref, max_ref):
        t = pl.program_id(1)
        x = feat_ref[...]                                   # (C_pad, tile)

        psum = jnp.sum(x, axis=1, keepdims=True)
        psq = jnp.sum(x * x, axis=1, keepdims=True)
        if padded:
            lane = t * tile + lax.broadcasted_iota(jnp.int32, (1, tile), 1)
            xm = jnp.where(lane < hw_valid, x, _NEG_LARGE)
        else:
            xm = x
        pmax = jnp.max(xm, axis=1, keepdims=True)

        @pl.when(t == 0)
        def _():
            sum_ref[...] = jnp.zeros_like(sum_ref)
            ssq_ref[...] = jnp.zeros_like(ssq_ref)
            max_ref[...] = jnp.zeros_like(max_ref) + _NEG_LARGE

        sum_ref[...] += psum
        ssq_ref[...] += psq
        max_ref[...] = jnp.maximum(max_ref[...], pmax)

    return kernel


# ----------------------------------------------------------------------------
# Path B phase 2: pure elementwise apply (both grid axes independent/parallel)
# ----------------------------------------------------------------------------
def _apply_kernel(feat_ref, mask_ref, sbg_ref, a_ref, b_ref, out_ref):
    x = feat_ref[...]                                       # (C_pad, tile)
    m = mask_ref[...]                                       # (1, tile)
    out_ref[...] = (x * sbg_ref[...] + m * (x * a_ref[...] + b_ref[...])
                    ).astype(out_ref.dtype)


# ----------------------------------------------------------------------------
# Wrapper: mask pooling, padding, path selection, weight packing
# ----------------------------------------------------------------------------
@functools.partial(jax.jit, static_argnames=("force_path", "tile_hint", "out_dtype"))
def rasc_xadain(feature, mask, params, *, force_path=None, tile_hint=None,
                out_dtype=None):
    """feature: (N, C, H, W) f32; mask: (N, 1, MH, MW) f32."""
    w1, b1, w2, b2 = params
    N, C, H, W = feature.shape
    MW = mask.shape[3]
    stride = MW // W
    hidden = w1.shape[2]
    out_dt = out_dtype if out_dtype is not None else feature.dtype

    # mask = round(avg_pool2d(mask, 2, stride=MW//W))  -- wrapper-side glue.
    pooled = lax.reduce_window(mask, 0.0, lax.add,
                               (1, 1, 2, 2), (1, 1, stride, stride),
                               'VALID') / 4.0
    assert pooled.shape[2:] == (H, W), "pooled mask must match feature spatial"
    m = jnp.round(pooled)

    HW = H * W
    feat_flat = feature.reshape(N, C, HW)          # free reshape, NO transpose
    mask_flat = m.reshape(N, 1, HW)

    C_pad = _round_up(C, 8)
    Hp = max(8, _round_up(hidden, 8))

    # ---- VMEM budget & path selection (per-generation, trace time) ---------
    vmem_cap = _vmem_capacity_bytes()
    usable = max(min(vmem_cap - (16 << 20), int(vmem_cap * 0.85)), 8 << 20)

    def vmem_block(rows, cols):                     # f32, (8,128)-tiled buffer
        return _round_up(max(rows, 1), 8) * _round_up(max(cols, 1), 128) * 4

    hw_pad_res = _round_up(HW, 128)
    weight_vmem = 2 * (3 * 3 * vmem_block(C_pad, Hp)     # w1a, w1b, w2k
                       + 3 * vmem_block(1, Hp)           # b1k
                       + 3 * vmem_block(C_pad, 1))       # b2k
    resident_bytes = (2 * (2 * vmem_block(C_pad, hw_pad_res)
                           + vmem_block(1, hw_pad_res))
                      + weight_vmem + (2 << 20))

    if force_path == "resident":
        use_resident = True
    elif force_path == "tiled":
        use_resident = False
    else:
        use_resident = resident_bytes <= usable

    # ======================================================================
    # Path A: whole-sample resident, single fused kernel (1x HBM read of x)
    # ======================================================================
    if use_resident:
        hw_pad = hw_pad_res
        feat_p = jnp.pad(feat_flat, ((0, 0), (0, C_pad - C), (0, hw_pad - HW)))
        mask_p = jnp.pad(mask_flat, ((0, 0), (0, 0), (0, hw_pad - HW)))

        pad_h = Hp - hidden
        w1a = jnp.pad(w1[:, :C, :], ((0, 0), (0, C_pad - C), (0, pad_h)))
        w1b = jnp.pad(w1[:, C:, :], ((0, 0), (0, C_pad - C), (0, pad_h)))
        b1k = jnp.pad(b1, ((0, 0), (0, pad_h))).reshape(3, 1, Hp)
        w2k = jnp.pad(jnp.swapaxes(w2, 1, 2),
                      ((0, 0), (0, C_pad - C), (0, pad_h)))
        b2k = jnp.pad(b2, ((0, 0), (0, C_pad - C))).reshape(3, C_pad, 1)

        kernel = _make_resident_kernel(hw_valid=HW, hw_pad=hw_pad)

        grid_spec = pltpu.PrefetchScalarGridSpec(
            num_scalar_prefetch=0,
            grid=(N,),
            in_specs=[
                pl.BlockSpec((None, C_pad, hw_pad), lambda n: (n, 0, 0)),
                pl.BlockSpec((None, 1, hw_pad), lambda n: (n, 0, 0)),
                pl.BlockSpec((3, C_pad, Hp), lambda n: (0, 0, 0)),
                pl.BlockSpec((3, C_pad, Hp), lambda n: (0, 0, 0)),
                pl.BlockSpec((3, 1, Hp), lambda n: (0, 0, 0)),
                pl.BlockSpec((3, C_pad, Hp), lambda n: (0, 0, 0)),
                pl.BlockSpec((3, C_pad, 1), lambda n: (0, 0, 0)),
            ],
            out_specs=pl.BlockSpec((None, C_pad, hw_pad), lambda n: (n, 0, 0)))

        out_p = pl.pallas_call(
            kernel,
            out_shape=jax.ShapeDtypeStruct((N, C_pad, hw_pad), out_dt),
            grid_spec=grid_spec,
            cost_estimate=pl.CostEstimate(
                flops=int(13 * N * C_pad * hw_pad),
                transcendentals=int(5 * N * C_pad),
                bytes_accessed=int((2 * C_pad * hw_pad + hw_pad) * 4 * N)),
            compiler_params=pltpu.CompilerParams(
                dimension_semantics=("parallel",),
                vmem_limit_bytes=int(usable)),
        )(feat_p, mask_p, w1a, w1b, b1k, w2k, b2k)

        return out_p[:, :C, :HW].reshape(N, C, H, W)

    # ======================================================================
    # Path B: HW-tiled two-phase (stats -> tiny FC in JAX -> apply)
    # ======================================================================
    budget = min(24 << 20, usable // 2)
    t_auto = max(128, (budget // (16 * C_pad)) // 128 * 128)
    tile = tile_hint if tile_hint is not None else min(t_auto, 2048,
                                                       _round_up(HW, 128))
    tile = max(128, (tile // 128) * 128)
    hw_pad = _round_up(HW, tile)
    n_tiles = hw_pad // tile

    feat_p = jnp.pad(feat_flat, ((0, 0), (0, C_pad - C), (0, hw_pad - HW)))
    mask_p = jnp.pad(mask_flat, ((0, 0), (0, 0), (0, hw_pad - HW)))

    # ---- phase 1: per-channel sum / sumsq / max ---------------------------
    stats_kernel = _make_stats_kernel(hw_valid=HW, tile=tile,
                                      padded=(hw_pad != HW))
    ssum, ssq, smax = pl.pallas_call(
        stats_kernel,
        out_shape=(jax.ShapeDtypeStruct((N, C_pad, 1), jnp.float32),) * 3,
        grid_spec=pltpu.PrefetchScalarGridSpec(
            num_scalar_prefetch=0,
            grid=(N, n_tiles),
            in_specs=[pl.BlockSpec((None, C_pad, tile), lambda n, t: (n, 0, t))],
            out_specs=[pl.BlockSpec((None, C_pad, 1), lambda n, t: (n, 0, 0))] * 3),
        cost_estimate=pl.CostEstimate(
            flops=int(4 * N * C_pad * hw_pad),
            transcendentals=0,
            bytes_accessed=int(N * C_pad * hw_pad * 4)),
        compiler_params=pltpu.CompilerParams(
            dimension_semantics=("parallel", "arbitrary"),
            vmem_limit_bytes=int(usable)),
    )(feat_p)

    # ---- tiny per-(N,C) math in plain JAX (negligible) --------------------
    # TODO(synk): for extreme |mean|/std ratios add a third (centered) stats
    #             pass; f32 sum/sumsq is adequate for typical activations.
    mu = ssum[:, :C, 0] / HW                                     # (N, C)
    var = jnp.maximum((ssq[:, :C, 0] - HW * mu * mu)
                      / float(max(HW - 1, 1)), 0.0)
    mx = smax[:, :C, 0]

    pooled_cat = jnp.concatenate([mu, mx], axis=1)               # (N, 2C)
    scales = []
    for i in range(3):
        h = jnp.maximum(
            jnp.dot(pooled_cat, w1[i], precision=lax.Precision.HIGHEST) + b1[i],
            0.0)
        scales.append(jax.nn.sigmoid(
            jnp.dot(h, w2[i], precision=lax.Precision.HIGHEST) + b2[i]))
    s_bg, s_sel, s_sp = scales                                   # (N, C) each

    std_s = jnp.sqrt(s_bg * s_bg * var + _EPS)
    rstd_c = lax.rsqrt(s_sp * s_sp * var + _EPS)
    coeff = s_sp * rstd_c * std_s
    a = s_sel - s_bg + coeff
    b = mu * (s_bg - coeff)

    def col(v):                                                  # -> (N, C_pad, 1)
        return jnp.pad(v, ((0, 0), (0, C_pad - C)))[:, :, None].astype(jnp.float32)

    sbg_col, a_col, b_col = col(s_bg), col(a), col(b)

    # ---- phase 2: fused elementwise apply (both axes parallel -> 2 TCs) ---
    out_p = pl.pallas_call(
        _apply_kernel,
        out_shape=jax.ShapeDtypeStruct((N, C_pad, hw_pad), out_dt),
        grid_spec=pltpu.PrefetchScalarGridSpec(
            num_scalar_prefetch=0,
            grid=(N, n_tiles),
            in_specs=[
                pl.BlockSpec((None, C_pad, tile), lambda n, t: (n, 0, t)),
                pl.BlockSpec((None, 1, tile), lambda n, t: (n, 0, t)),
                pl.BlockSpec((None, C_pad, 1), lambda n, t: (n, 0, 0)),
                pl.BlockSpec((None, C_pad, 1), lambda n, t: (n, 0, 0)),
                pl.BlockSpec((None, C_pad, 1), lambda n, t: (n, 0, 0)),
            ],
            out_specs=pl.BlockSpec((None, C_pad, tile), lambda n, t: (n, 0, t))),
        cost_estimate=pl.CostEstimate(
            flops=int(4 * N * C_pad * hw_pad),
            transcendentals=0,
            bytes_accessed=int(2 * N * C_pad * hw_pad * 4)),
        compiler_params=pltpu.CompilerParams(
            dimension_semantics=("parallel", "parallel"),
            vmem_limit_bytes=int(usable)),
    )(feat_p, mask_p, sbg_col, a_col, b_col)

    return out_p[:, :C, :HW].reshape(N, C, H, W)


# ----------------------------------------------------------------------------
# Deterministic parameter init (3 GlobalAttentionModules, reduction=16):
# per module W1 (2C,h), b1 (h,), W2 (h,C), b2 (C,)
# ----------------------------------------------------------------------------
def init_params(key, channel, reduction=16):
    hidden = max(1, channel // reduction)
    keys = jax.random.split(key, 12)
    w1, b1, w2, b2 = [], [], [], []
    for i in range(3):
        k1, k2, k3, k4 = keys[4 * i:4 * i + 4]
        w1.append(jax.random.normal(k1, (2 * channel, hidden), jnp.float32) * 0.1)
        b1.append(jax.random.normal(k2, (hidden,), jnp.float32) * 0.1)
        w2.append(jax.random.normal(k3, (hidden, channel), jnp.float32) * 0.1)
        b2.append(jax.random.normal(k4, (channel,), jnp.float32) * 0.1)
    return (jnp.stack(w1), jnp.stack(b1), jnp.stack(w2), jnp.stack(b2))


# ----------------------------------------------------------------------------
# Pure-JAX reference (mirrors the PyTorch forward) for verification
# ----------------------------------------------------------------------------
def reference_forward(feature, mask, params):
    w1, b1, w2, b2 = params
    N, C, H, W = feature.shape
    stride = mask.shape[3] // W
    pooled = lax.reduce_window(mask, 0.0, lax.add,
                               (1, 1, 2, 2), (1, 1, stride, stride),
                               'VALID') / 4.0
    m = jnp.round(pooled)
    rm = 1.0 - m

    def gam(x, i):
        avg = jnp.mean(x, axis=(2, 3))
        mx = jnp.max(x, axis=(2, 3))
        pooled_cat = jnp.concatenate([avg, mx], axis=1)
        h = jnp.maximum(
            jnp.dot(pooled_cat, w1[i], precision=lax.Precision.HIGHEST) + b1[i],
            0.0)
        s = jax.nn.sigmoid(
            jnp.dot(h, w2[i], precision=lax.Precision.HIGHEST) + b2[i])
        return x * s[:, :, None, None]

    bg = gam(feature, 0)
    sel = gam(feature, 1)
    sp = gam(feature, 2)

    def mean_std(z):
        zf = z.reshape(N, C, -1)
        mu = zf.mean(-1)[:, :, None, None]
        var = zf.var(-1, ddof=1)[:, :, None, None]
        return mu, jnp.sqrt(var + 1e-5)

    sm, ss = mean_std(bg)
    cm, cs = mean_std(sp)
    adain = (sp - cm) / cs * ss + sm
    spliced = adain + sel
    return bg * rm + spliced * m


if __name__ == "__main__":
    key = jax.random.PRNGKey(0)
    kf, km, kp, kf2, km2, kp2 = jax.random.split(key, 6)

    # --- case 1: aligned shapes (C%8==0, HW%128==0) --------------------------
    N, C, H, W = 2, 32, 16, 16
    feature = jax.random.normal(kf, (N, C, H, W), jnp.float32)
    mask = (jax.random.uniform(km, (N, 1, 2 * H, 2 * W)) > 0.5).astype(jnp.float32)
    params = init_params(kp, C)
    ref = reference_forward(feature, mask, params)

    out_auto = jax.block_until_ready(rasc_xadain(feature, mask, params))
    assert out_auto.shape == (N, C, H, W)
    d = float(jnp.max(jnp.abs(out_auto - ref)))
    assert d < 1e-3, f"auto path mismatch: {d}"

    out_tiled = jax.block_until_ready(
        rasc_xadain(feature, mask, params, force_path="tiled", tile_hint=128))
    d = float(jnp.max(jnp.abs(out_tiled - ref)))
    assert d < 1e-3, f"tiled path mismatch: {d}"

    # --- case 2: unaligned shapes exercise the C/HW padding paths ------------
    N2, C2, H2, W2 = 2, 20, 14, 14
    feature2 = jax.random.normal(kf2, (N2, C2, H2, W2), jnp.float32)
    mask2 = (jax.random.uniform(km2, (N2, 1, 2 * H2, 2 * W2)) > 0.5).astype(jnp.float32)
    params2 = init_params(kp2, C2)
    ref2 = reference_forward(feature2, mask2, params2)

    out2_res = jax.block_until_ready(
        rasc_xadain(feature2, mask2, params2, force_path="resident"))
    d = float(jnp.max(jnp.abs(out2_res - ref2)))
    assert d < 1e-3, f"resident (padded) mismatch: {d}"

    out2_til = jax.block_until_ready(
        rasc_xadain(feature2, mask2, params2, force_path="tiled", tile_hint=128))
    d = float(jnp.max(jnp.abs(out2_til - ref2)))
    assert d < 1e-3, f"tiled (padded) mismatch: {d}"

    print("KERNEL_OK")
</pallas_src>

<mosaic_0001>
module attributes {stable_mosaic.version = 11 : i64} {
  func.func @kernel(%arg0: i32, %arg1: memref<1x32x256xf32, #tpu.memory_space<vmem>>, %arg2: memref<1x1x256xf32, #tpu.memory_space<vmem>>, %arg3: memref<3x32x8xf32, #tpu.memory_space<vmem>>, %arg4: memref<3x32x8xf32, #tpu.memory_space<vmem>>, %arg5: memref<3x1x8xf32, #tpu.memory_space<vmem>>, %arg6: memref<3x32x8xf32, #tpu.memory_space<vmem>>, %arg7: memref<3x32x1xf32, #tpu.memory_space<vmem>>, %arg8: memref<1x32x256xf32, #tpu.memory_space<vmem>>) attributes {dimension_semantics = [#tpu.dimension_semantics<parallel>], iteration_bounds = array<i64: 2>, scalar_prefetch = 0 : i64, scratch_operands = 0 : i64, tpu.core_type = #tpu.core_type<tc>, window_params = [{transform_indices = @transform_0, window_bounds = array<i64: 1, 32, 256>}, {transform_indices = @transform_1, window_bounds = array<i64: 1, 1, 256>}, {pipeline_mode = #tpu.pipeline_mode<synchronous>, transform_indices = @transform_2, window_bounds = array<i64: 3, 32, 8>}, {pipeline_mode = #tpu.pipeline_mode<synchronous>, transform_indices = @transform_3, window_bounds = array<i64: 3, 32, 8>}, {pipeline_mode = #tpu.pipeline_mode<synchronous>, transform_indices = @transform_4, window_bounds = array<i64: 3, 1, 8>}, {pipeline_mode = #tpu.pipeline_mode<synchronous>, transform_indices = @transform_5, window_bounds = array<i64: 3, 32, 8>}, {pipeline_mode = #tpu.pipeline_mode<synchronous>, transform_indices = @transform_6, window_bounds = array<i64: 3, 32, 1>}, {transform_indices = @transform_7, window_bounds = array<i64: 1, 32, 256>}]} {
    %c0 = arith.constant 0 : index
    %c0_0 = arith.constant 0 : index
    %c0_1 = arith.constant 0 : index
    %0 = vector.load %arg1[%c0, %c0_0, %c0_1] : memref<1x32x256xf32, #tpu.memory_space<vmem>>, vector<1x32x256xf32>
    %1 = vector.shape_cast %0 : vector<1x32x256xf32> to vector<32x256xf32>
    %c0_2 = arith.constant 0 : index
    %c0_3 = arith.constant 0 : index
    %c0_4 = arith.constant 0 : index
    %2 = vector.load %arg2[%c0_2, %c0_3, %c0_4] : memref<1x1x256xf32, #tpu.memory_space<vmem>>, vector<1x1x256xf32>
    %3 = vector.shape_cast %2 : vector<1x1x256xf32> to vector<1x256xf32>
    %cst = arith.constant dense<0.000000e+00> : vector<32xf32>
    %4 = vector.multi_reduction <add>, %1, %cst [1] : vector<32x256xf32> to vector<32xf32>
    %5 = vector.shape_cast %4 : vector<32xf32> to vector<32x1xf32>
    %cst_5 = arith.constant 3.906250e-03 : f32
    %6 = vector.broadcast %cst_5 : f32 to vector<32x1xf32>
    %7 = arith.mulf %5, %6 : vector<32x1xf32>
    %cst_6 = arith.constant dense<0xFF800000> : vector<32xf32>
    %8 = vector.multi_reduction <maximumf>, %1, %cst_6 [1] : vector<32x256xf32> to vector<32xf32>
    %9 = vector.shape_cast %8 : vector<32xf32> to vector<32x1xf32>
    %10 = vector.broadcast %7 : vector<32x1xf32> to vector<32x256xf32>
    %11 = arith.subf %1, %10 : vector<32x256xf32>
    %12 = arith.mulf %11, %11 : vector<32x256xf32>
    %cst_7 = arith.constant dense<0.000000e+00> : vector<32xf32>
    %13 = vector.multi_reduction <add>, %12, %cst_7 [1] : vector<32x256xf32> to vector<32xf32>
    %14 = vector.shape_cast %13 : vector<32xf32> to vector<32x1xf32>
    %cst_8 = arith.constant 0.00392156886 : f32
    %15 = vector.broadcast %cst_8 : f32 to vector<32x1xf32>
    %16 = arith.mulf %14, %15 : vector<32x1xf32>
    %cst_9 = arith.constant 0.000000e+00 : f32
    %17 = vector.broadcast %cst_9 : f32 to vector<32x1xf32>
    %18 = arith.maximumf %16, %17 : vector<32x1xf32>
    %c0_10 = arith.constant 0 : index
    %c0_11 = arith.constant 0 : index
    %c0_12 = arith.constant 0 : index
    %19 = vector.load %arg3[%c0_10, %c0_11, %c0_12] : memref<3x32x8xf32, #tpu.memory_space<vmem>>, vector<1x32x8xf32>
    %20 = vector.shape_cast %19 : vector<1x32x8xf32> to vector<32x8xf32>
    %21 = vector.broadcast %7 : vector<32x1xf32> to vector<32x8xf32>
    %22 = arith.mulf %20, %21 : vector<32x8xf32>
    %c0_13 = arith.constant 0 : index
    %c0_14 = arith.constant 0 : index
    %c0_15 = arith.constant 0 : index
    %23 = vector.load %arg4[%c0_13, %c0_14, %c0_15] : memref<3x32x8xf32, #tpu.memory_space<vmem>>, vector<1x32x8xf32>
    %24 = vector.shape_cast %23 : vector<1x32x8xf32> to vector<32x8xf32>
    %25 = vector.broadcast %9 : vector<32x1xf32> to vector<32x8xf32>
    %26 = arith.mulf %24, %25 : vector<32x8xf32>
    %27 = arith.addf %22, %26 : vector<32x8xf32>
    %cst_16 = arith.constant dense<0.000000e+00> : vector<8xf32>
    %28 = vector.multi_reduction <add>, %27, %cst_16 [0] : vector<32x8xf32> to vector<8xf32>
    %29 = vector.shape_cast %28 : vector<8xf32> to vector<1x8xf32>
    %c0_17 = arith.constant 0 : index
    %c0_18 = arith.constant 0 : index
    %c0_19 = arith.constant 0 : index
    %30 = vector.load %arg5[%c0_17, %c0_18, %c0_19] : memref<3x1x8xf32, #tpu.memory_space<vmem>>, vector<1x1x8xf32>
    %31 = vector.shape_cast %30 : vector<1x1x8xf32> to vector<1x8xf32>
    %32 = arith.addf %29, %31 : vector<1x8xf32>
    %cst_20 = arith.constant 0.000000e+00 : f32
    %33 = vector.broadcast %cst_20 : f32 to vector<1x8xf32>
    %34 = arith.maximumf %32, %33 : vector<1x8xf32>
    %c0_21 = arith.constant 0 : index
    %c0_22 = arith.constant 0 : index
    %c0_23 = arith.constant 0 : index
    %35 = vector.load %arg6[%c0_21, %c0_22, %c0_23] : memref<3x32x8xf32, #tpu.memory_space<vmem>>, vector<1x32x8xf32>
    %36 = vector.shape_cast %35 : vector<1x32x8xf32> to vector<32x8xf32>
    %37 = vector.broadcast %34 : vector<1x8xf32> to vector<32x8xf32>
    %38 = arith.mulf %36, %37 : vector<32x8xf32>
    %cst_24 = arith.constant dense<0.000000e+00> : vector<32xf32>
    %39 = vector.multi_reduction <add>, %38, %cst_24 [1] : vector<32x8xf32> to vector<32xf32>
    %40 = vector.shape_cast %39 : vector<32xf32> to vector<32x1xf32>
    %c0_25 = arith.constant 0 : index
    %c0_26 = arith.constant 0 : index
    %c0_27 = arith.constant 0 : index
    %41 = vector.load %arg7[%c0_25, %c0_26, %c0_27] : memref<3x32x1xf32, #tpu.memory_space<vmem>>, vector<1x32x1xf32>
    %42 = vector.shape_cast %41 : vector<1x32x1xf32> to vector<32x1xf32>
    %43 = arith.addf %40, %42 : vector<32x1xf32>
    %44 = arith.negf %43 : vector<32x1xf32>
    %45 = math.exp %44 : vector<32x1xf32>
    %cst_28 = arith.constant 1.000000e+00 : f32
    %46 = vector.broadcast %cst_28 : f32 to vector<32x1xf32>
    %47 = arith.addf %46, %45 : vector<32x1xf32>
    %48 = arith.divf %46, %47 : vector<32x1xf32>
    %c1 = arith.constant 1 : index
    %c0_29 = arith.constant 0 : index
    %c0_30 = arith.constant 0 : index
    %49 = vector.load %arg3[%c1, %c0_29, %c0_30] : memref<3x32x8xf32, #tpu.memory_space<vmem>>, vector<1x32x8xf32>
    %50 = vector.shape_cast %49 : vector<1x32x8xf32> to vector<32x8xf32>
    %51 = vector.broadcast %7 : vector<32x1xf32> to vector<32x8xf32>
    %52 = arith.mulf %50, %51 : vector<32x8xf32>
    %c1_31 = arith.constant 1 : index
    %c0_32 = arith.constant 0 : index
    %c0_33 = arith.constant 0 : index
    %53 = vector.load %arg4[%c1_31, %c0_32, %c0_33] : memref<3x32x8xf32, #tpu.memory_space<vmem>>, vector<1x32x8xf32>
    %54 = vector.shape_cast %53 : vector<1x32x8xf32> to vector<32x8xf32>
    %55 = vector.broadcast %9 : vector<32x1xf32> to vector<32x8xf32>
    %56 = arith.mulf %54, %55 : vector<32x8xf32>
    %57 = arith.addf %52, %56 : vector<32x8xf32>
    %cst_34 = arith.constant dense<0.000000e+00> : vector<8xf32>
    %58 = vector.multi_reduction <add>, %57, %cst_34 [0] : vector<32x8xf32> to vector<8xf32>
    %59 = vector.shape_cast %58 : vector<8xf32> to vector<1x8xf32>
    %c1_35 = arith.constant 1 : index
    %c0_36 = arith.constant 0 : index
    %c0_37 = arith.constant 0 : index
    %60 = vector.load %arg5[%c1_35, %c0_36, %c0_37] : memref<3x1x8xf32, #tpu.memory_space<vmem>>, vector<1x1x8xf32>
    %61 = vector.shape_cast %60 : vector<1x1x8xf32> to vector<1x8xf32>
    %62 = arith.addf %59, %61 : vector<1x8xf32>
    %cst_38 = arith.constant 0.000000e+00 : f32
    %63 = vector.broadcast %cst_38 : f32 to vector<1x8xf32>
    %64 = arith.maximumf %62, %63 : vector<1x8xf32>
    %c1_39 = arith.constant 1 : index
    %c0_40 = arith.constant 0 : index
    %c0_41 = arith.constant 0 : index
    %65 = vector.load %arg6[%c1_39, %c0_40, %c0_41] : memref<3x32x8xf32, #tpu.memory_space<vmem>>, vector<1x32x8xf32>
    %66 = vector.shape_cast %65 : vector<1x32x8xf32> to vector<32x8xf32>
    %67 = vector.broadcast %64 : vector<1x8xf32> to vector<32x8xf32>
    %68 = arith.mulf %66, %67 : vector<32x8xf32>
    %cst_42 = arith.constant dense<0.000000e+00> : vector<32xf32>
    %69 = vector.multi_reduction <add>, %68, %cst_42 [1] : vector<32x8xf32> to vector<32xf32>
    %70 = vector.shape_cast %69 : vector<32xf32> to vector<32x1xf32>
    %c1_43 = arith.constant 1 : index
    %c0_44 = arith.constant 0 : index
    %c0_45 = arith.constant 0 : index
    %71 = vector.load %arg7[%c1_43, %c0_44, %c0_45] : memref<3x32x1xf32, #tpu.memory_space<vmem>>, vector<1x32x1xf32>
    %72 = vector.shape_cast %71 : vector<1x32x1xf32> to vector<32x1xf32>
    %73 = arith.addf %70, %72 : vector<32x1xf32>
    %74 = arith.negf %73 : vector<32x1xf32>
    %75 = math.exp %74 : vector<32x1xf32>
    %cst_46 = arith.constant 1.000000e+00 : f32
    %76 = vector.broadcast %cst_46 : f32 to vector<32x1xf32>
    %77 = arith.addf %76, %75 : vector<32x1xf32>
    %78 = arith.divf %76, %77 : vector<32x1xf32>
    %c2 = arith.constant 2 : index
    %c0_47 = arith.constant 0 : index
    %c0_48 = arith.constant 0 : index
    %79 = vector.load %arg3[%c2, %c0_47, %c0_48] : memref<3x32x8xf32, #tpu.memory_space<vmem>>, vector<1x32x8xf32>
    %80 = vector.shape_cast %79 : vector<1x32x8xf32> to vector<32x8xf32>
    %81 = vector.broadcast %7 : vector<32x1xf32> to vector<32x8xf32>
    %82 = arith.mulf %80, %81 : vector<32x8xf32>
    %c2_49 = arith.constant 2 : index
    %c0_50 = arith.constant 0 : index
    %c0_51 = arith.constant 0 : index
    %83 = vector.load %arg4[%c2_49, %c0_50, %c0_51] : memref<3x32x8xf32, #tpu.memory_space<vmem>>, vector<1x32x8xf32>
    %84 = vector.shape_cast %83 : vector<1x32x8xf32> to vector<32x8xf32>
    %85 = vector.broadcast %9 : vector<32x1xf32> to vector<32x8xf32>
    %86 = arith.mulf %84, %85 : vector<32x8xf32>
    %87 = arith.addf %82, %86 : vector<32x8xf32>
    %cst_52 = arith.constant dense<0.000000e+00> : vector<8xf32>
    %88 = vector.multi_reduction <add>, %87, %cst_52 [0] : vector<32x8xf32> to vector<8xf32>
    %89 = vector.shape_cast %88 : vector<8xf32> to vector<1x8xf32>
    %c2_53 = arith.constant 2 : index
    %c0_54 = arith.constant 0 : index
    %c0_55 = arith.constant 0 : index
    %90 = vector.load %arg5[%c2_53, %c0_54, %c0_55] : memref<3x1x8xf32, #tpu.memory_space<vmem>>, vector<1x1x8xf32>
    %91 = vector.shape_cast %90 : vector<1x1x8xf32> to vector<1x8xf32>
    %92 = arith.addf %89, %91 : vector<1x8xf32>
    %cst_56 = arith.constant 0.000000e+00 : f32
    %93 = vector.broadcast %cst_56 : f32 to vector<1x8xf32>
    %94 = arith.maximumf %92, %93 : vector<1x8xf32>
    %c2_57 = arith.constant 2 : index
    %c0_58 = arith.constant 0 : index
    %c0_59 = arith.constant 0 : index
    %95 = vector.load %arg6[%c2_57, %c0_58, %c0_59] : memref<3x32x8xf32, #tpu.memory_space<vmem>>, vector<1x32x8xf32>
    %96 = vector.shape_cast %95 : vector<1x32x8xf32> to vector<32x8xf32>
    %97 = vector.broadcast %94 : vector<1x8xf32> to vector<32x8xf32>
    %98 = arith.mulf %96, %97 : vector<32x8xf32>
    %cst_60 = arith.constant dense<0.000000e+00> : vector<32xf32>
    %99 = vector.multi_reduction <add>, %98, %cst_60 [1] : vector<32x8xf32> to vector<32xf32>
    %100 = vector.shape_cast %99 : vector<32xf32> to vector<32x1xf32>
    %c2_61 = arith.constant 2 : index
    %c0_62 = arith.constant 0 : index
    %c0_63 = arith.constant 0 : index
    %101 = vector.load %arg7[%c2_61, %c0_62, %c0_63] : memref<3x32x1xf32, #tpu.memory_space<vmem>>, vector<1x32x1xf32>
    %102 = vector.shape_cast %101 : vector<1x32x1xf32> to vector<32x1xf32>
    %103 = arith.addf %100, %102 : vector<32x1xf32>
    %104 = arith.negf %103 : vector<32x1xf32>
    %105 = math.exp %104 : vector<32x1xf32>
    %cst_64 = arith.constant 1.000000e+00 : f32
    %106 = vector.broadcast %cst_64 : f32 to vector<32x1xf32>
    %107 = arith.addf %106, %105 : vector<32x1xf32>
    %108 = arith.divf %106, %107 : vector<32x1xf32>
    %109 = arith.mulf %48, %48 : vector<32x1xf32>
    %110 = arith.mulf %109, %18 : vector<32x1xf32>
    %cst_65 = arith.constant 9.99999974E-6 : f32
    %111 = vector.broadcast %cst_65 : f32 to vector<32x1xf32>
    %112 = arith.addf %110, %111 : vector<32x1xf32>
    %113 = math.sqrt %112 : vector<32x1xf32>
    %114 = arith.mulf %108, %108 : vector<32x1xf32>
    %115 = arith.mulf %114, %18 : vector<32x1xf32>
    %cst_66 = arith.constant 9.99999974E-6 : f32
    %116 = vector.broadcast %cst_66 : f32 to vector<32x1xf32>
    %117 = arith.addf %115, %116 : vector<32x1xf32>
    %118 = math.rsqrt %117 : vector<32x1xf32>
    %119 = arith.mulf %108, %118 : vector<32x1xf32>
    %120 = arith.mulf %119, %113 : vector<32x1xf32>
    %121 = arith.subf %78, %48 : vector<32x1xf32>
    %122 = arith.addf %121, %120 : vector<32x1xf32>
    %123 = arith.subf %48, %120 : vector<32x1xf32>
    %124 = arith.mulf %7, %123 : vector<32x1xf32>
    %125 = vector.broadcast %48 : vector<32x1xf32> to vector<32x256xf32>
    %126 = arith.mulf %1, %125 : vector<32x256xf32>
    %127 = vector.broadcast %122 : vector<32x1xf32> to vector<32x256xf32>
    %128 = arith.mulf %1, %127 : vector<32x256xf32>
    %129 = vector.broadcast %124 : vector<32x1xf32> to vector<32x256xf32>
    %130 = arith.addf %128, %129 : vector<32x256xf32>
    %131 = vector.broadcast %3 : vector<1x256xf32> to vector<32x256xf32>
    %132 = arith.mulf %131, %130 : vector<32x256xf32>
    %133 = arith.addf %126, %132 : vector<32x256xf32>
    %c0_67 = arith.constant 0 : index
    %c0_68 = arith.constant 0 : index
    %c0_69 = arith.constant 0 : index
    %134 = vector.load %arg8[%c0_67, %c0_68, %c0_69] : memref<1x32x256xf32, #tpu.memory_space<vmem>>, vector<1x32x256xf32>
    %135 = vector.shape_cast %134 : vector<1x32x256xf32> to vector<32x256xf32>
    %136 = vector.shape_cast %133 : vector<32x256xf32> to vector<1x32x256xf32>
    tpu.vector_store %arg8[%c0_67, %c0_68, %c0_69], %136 {strides = array<i32>} : memref<1x32x256xf32, #tpu.memory_space<vmem>>, vector<1x32x256xf32>,
    return
  }
  func.func @transform_0(%arg0: i32) -> (i32, i32, i32) {
    %c0_i32 = arith.constant 0 : i32
    %c0_i32_0 = arith.constant 0 : i32
    %c0_i32_1 = arith.constant 0 : i32
    return %arg0, %c0_i32, %c0_i32_0 : i32, i32, i32
  }
  func.func @transform_1(%arg0: i32) -> (i32, i32, i32) {
    %c0_i32 = arith.constant 0 : i32
    %c0_i32_0 = arith.constant 0 : i32
    %c0_i32_1 = arith.constant 0 : i32
    return %arg0, %c0_i32, %c0_i32_0 : i32, i32, i32
  }
  func.func @transform_2(%arg0: i32) -> (i32, i32, i32) {
    %c0_i32 = arith.constant 0 : i32
    %c0_i32_0 = arith.constant 0 : i32
    %c0_i32_1 = arith.constant 0 : i32
    %c0_i32_2 = arith.constant 0 : i32
    return %c0_i32, %c0_i32_0, %c0_i32_1 : i32, i32, i32
  }
  func.func @transform_3(%arg0: i32) -> (i32, i32, i32) {
    %c0_i32 = arith.constant 0 : i32
    %c0_i32_0 = arith.constant 0 : i32
    %c0_i32_1 = arith.constant 0 : i32
    %c0_i32_2 = arith.constant 0 : i32
    return %c0_i32, %c0_i32_0, %c0_i32_1 : i32, i32, i32
  }
  func.func @transform_4(%arg0: i32) -> (i32, i32, i32) {
    %c0_i32 = arith.constant 0 : i32
    %c0_i32_0 = arith.constant 0 : i32
    %c0_i32_1 = arith.constant 0 : i32
    %c0_i32_2 = arith.constant 0 : i32
    return %c0_i32, %c0_i32_0, %c0_i32_1 : i32, i32, i32
  }
  func.func @transform_5(%arg0: i32) -> (i32, i32, i32) {
    %c0_i32 = arith.constant 0 : i32
    %c0_i32_0 = arith.constant 0 : i32
    %c0_i32_1 = arith.constant 0 : i32
    %c0_i32_2 = arith.constant 0 : i32
    return %c0_i32, %c0_i32_0, %c0_i32_1 : i32, i32, i32
  }
  func.func @transform_6(%arg0: i32) -> (i32, i32, i32) {
    %c0_i32 = arith.constant 0 : i32
    %c0_i32_0 = arith.constant 0 : i32
    %c0_i32_1 = arith.constant 0 : i32
    %c0_i32_2 = arith.constant 0 : i32
    return %c0_i32, %c0_i32_0, %c0_i32_1 : i32, i32, i32
  }
  func.func @transform_7(%arg0: i32) -> (i32, i32, i32) {
    %c0_i32 = arith.constant 0 : i32
    %c0_i32_0 = arith.constant 0 : i32
    %c0_i32_1 = arith.constant 0 : i32
    return %arg0, %c0_i32, %c0_i32_0 : i32, i32, i32
  }
}

</mosaic_0001>

<bundles_post_ra>
// kernel: rasc_xadain.1
= control target key start
LH: loop header
LB: loop body
LE: loop exit
PB: predicated region body
PF: predicated region fallthrough
CT: control target
= control target key end

     0   :  { %s1106_s24 = smov 0   ;;  %s1484_s0 = inlined_call_operand.vmem [shape: f32[2,32,256], index: 0, kind: input, shape index: {}]   ;;  %s1485_s1 = inlined_call_operand.vmem [shape: f32[2,1,256], index: 1, kind: input, shape index: {}]   ;;  %s1486_s2 = inlined_call_operand.vmem [shape: f32[3,32,8], index: 2, kind: input, shape index: {}]   ;;  %s1487_s3 = inlined_call_operand.vmem [shape: f32[3,32,8], index: 3, kind: input, shape index: {}]   ;;  %s1488_s4 = inlined_call_operand.vmem [shape: f32[3,1,8], index: 4, kind: input, shape index: {}]   ;;  %s1489_s5 = inlined_call_operand.vmem [shape: f32[3,32,8], index: 5, kind: input, shape index: {}]   ;;  %s1490_s6 = inlined_call_operand.vmem [shape: f32[3,32,1], index: 6, kind: input, shape index: {}]   ;;  %s1491_s7 = inlined_call_operand.vmem [shape: f32[2,32,256], index: 7, kind: output, shape index: {}]  }
   0x1 LB: > { %s922_s25 = sadd.s32 4294967295, %s1063_s24   ;;  %p926_p0 = scmp.ge.s32.totalorder %s1063_s24, 1  ;;  %s1063_s24 = sphi %s1106_s24, %s17_s24  }
   0x2   : > { %p246_p1 = scmp.lt.s32.totalorder %s1063_s24, 3 }
   0x4   : > { %p247_p2 = pnand %p926_p0, %p246_p1 }
   0x5   : > { %p282_p3 = scmp.lt.s32.totalorder (!%p247_p2), %s922_s25, 1  ;;  %v377_v20 = vld [vmem:[%s1487_s3] sm:$0xff] (!%p247_p2)  ;;  %v371_v25 = vld [vmem:[%s1486_s2 + $0x10] sm:$0xff] (!%p247_p2)  ;;  %v370_v28 = vld [vmem:[%s1486_s2 + $0x8] sm:$0xff] (!%p247_p2)  ;;  %vm389_vm0 = vcmask (!%p247_p2), 64512  }
   0x6   : > { %250 = sbr.rel (%p247_p2) target bundleno = 569 (0x239), region = 48  ;;  %v369_v22 = vld [vmem:[%s1486_s2] sm:$0xff] (!%p247_p2)  ;;  %v937_v29 = vld [vmem:[%s1486_s2 + $0x28] sm:$0xff] (!%p247_p2)  ;;  %v372_v45 = vld [vmem:[%s1486_s2 + $0x18] sm:$0xff] (!%p247_p2) }
   0x7   : > { %v940_v23 = vld [vmem:[%s1487_s3 + $0x20] sm:$0xff] (!%p247_p2)  ;;  %v378_v31 = vld [vmem:[%s1487_s3 + $0x8] sm:$0xff] (!%p247_p2)  ;;  %v938_v46 = vld [vmem:[%s1486_s2 + $0x30] sm:$0xff] (!%p247_p2) }
   0x8   : > { %v961_v26 = vld [vmem:[%s1487_s3 + $0x40] sm:$0xff] (!%p247_p2)  ;;  %v941_v32 = vld [vmem:[%s1487_s3 + $0x28] sm:$0xff] (!%p247_p2)  ;;  %v380_v51 = vld [vmem:[%s1487_s3 + $0x18] sm:$0xff] (!%p247_p2) }
   0x9   : > { %v962_v33 = vld [vmem:[%s1487_s3 + $0x48] sm:$0xff] (!%p247_p2)  ;;  %v936_v34 = vld [vmem:[%s1486_s2 + $0x20] sm:$0xff] (!%p247_p2)  ;;  %v939_v56 = vld [vmem:[%s1486_s2 + $0x38] sm:$0xff] (!%p247_p2) }
   0xa   : > { %v957_v35 = vld [vmem:[%s1486_s2 + $0x40] sm:$0xff] (!%p247_p2)  ;;  %v958_v38 = vld [vmem:[%s1486_s2 + $0x48] sm:$0xff] (!%p247_p2)  ;;  %v943_v57 = vld [vmem:[%s1487_s3 + $0x38] sm:$0xff] (!%p247_p2) }
   0xb   : > { %v379_v58 = vld [vmem:[%s1487_s3 + $0x10] sm:$0xff] (!%p247_p2)  ;;  %v960_v62 = vld [vmem:[%s1486_s2 + $0x58] sm:$0xff] (!%p247_p2) }
   0xc   : > { %v964_v63 = vld [vmem:[%s1487_s3 + $0x58] sm:$0xff] (!%p247_p2) }
   0xd   : > { %s1493_s25 = smov (!%p282_p3, %s922_s25), 1 }
   0xe   : > { %s980_s26 = sshll.u32 %s1493_s25, 6  ;;  %s929_s9 = sshll.u32 %s1493_s25, 1 }
   0xf   : > { %s286_s29 = scalar_lea.vmem %s1484_s0, %s980_s26  ;;  %s290_s12 = scalar_lea.vmem %s1485_s1, %s929_s9 }
  0x10   : > { %v1122_v0 = vld [vmem:[%s286_s29 + $0x20] sm:$0xff]  ;;  %v1124_v1 = vld [vmem:[%s286_s29 + $0x28] sm:$0xff]  ;;  %v1132_v5 = vld [vmem:[%s286_s29 + $0x10] sm:$0xff]  ;;  %s1461_s15 = scalar_lea.vmem %s1491_s7, %s980_s26 }
  0x11   : > { %v1126_v2 = vld [vmem:[%s286_s29] sm:$0xff]  ;;  %v311_v3 = vadd.f32 %v1124_v1, %v1122_v0  ;;  %v1130_v4 = vld [vmem:[%s286_s29 + $0x8] sm:$0xff]  ;;  %v1134_v6 = vld [vmem:[%s286_s29 + $0x18] sm:$0xff]  ;;  %v327_v15 = vmax.f32 %v1122_v0, %v1124_v1 }
  0x12   : > { %v305_v7 = vadd.f32 %v1130_v4, %v1126_v2  ;;  %v321_v8 = vmax.f32 %v1126_v2, %v1130_v4  ;;  %v308_v9 = vadd.f32 %v1134_v6, %v1132_v5  ;;  %v1142_v10 = vld [vmem:[%s286_s29 + $0x30] sm:$0xff]  ;;  %v1144_v11 = vld [vmem:[%s286_s29 + $0x38] sm:$0xff]  ;;  %v324_v13 = vmax.f32 %v1132_v5, %v1134_v6 }
  0x13   : > { %312 = vadd.xlane.f32.xlu1 %v311_v3  ;;  %v314_v12 = vadd.f32 %v1144_v11, %v1142_v10  ;;  %v330_v14 = vmax.f32 %v1142_v10, %v1144_v11 }
  0x14   : > { %306 = vadd.xlane.f32.xlu0 %v305_v7 }
  0x17   : > { %322 = vmax.xlane.f32.xlu1 %v321_v8  ;;  %v959_v8 = vld [vmem:[%s1486_s2 + $0x50] sm:$0xff] }
  0x18   : > { %309 = vadd.xlane.f32.xlu0 %v308_v9 }
  0x1b   : > { %315 = vadd.xlane.f32.xlu1 %v314_v12 }
  0x1c   : > { %325 = vmax.xlane.f32.xlu0 %v324_v13 }
  0x1f   : > { %331 = vmax.xlane.f32.xlu1 %v330_v14 }
  0x20   : > { %328 = vmax.xlane.f32.xlu0 %v327_v15  ;;  %v942_v15 = vld [vmem:[%s1487_s3 + $0x30] sm:$0xff] }
  0xa0   : > { %v313_v16 = vpop.xlane.xlu1 %312 }
  0xa1   : > { %v307_v17 = vpop.xlane.xlu0 %306  ;;  %v1154_v18 = vmul.f32 0.00390625, %v313_v16 }
  0xa2   : > { %v1156_v19 = vmul.f32 0.00390625, %v307_v17 }
  0xa3   : > { %v375_v39 = vmul.f32 %v371_v25, %v1154_v18  ;;  %v469_v7 = vmul.f32 %v938_v46, %v1154_v18 }
  0xa4   : > { %v323_v21 = vpop.xlane.xlu1 %322  ;;  %v373_v36 = vmul.f32 %v369_v22, %v1156_v19  ;;  %v467_v53 = vmul.f32 %v936_v34, %v1156_v19  ;;  %v564_v54 = vmul.f32 %v957_v35, %v1156_v19  ;;  %v963_v22 = vld [vmem:[%s1487_s3 + $0x50] sm:$0xff] }
  0xa5   : > { %v310_v24 = vpop.xlane.xlu0 %309  ;;  %v381_v30 = vmul.f32 %v377_v20, %v323_v21  ;;  %v476_v40 = vmul.f32 %v940_v23, %v323_v21  ;;  %v573_v41 = vmul.f32 %v961_v26, %v323_v21 }
  0xa6   : > { %v1173_v27 = vmul.f32 0.00390625, %v310_v24 }
  0xa7   : > { %v385_v52 = vadd.f32 %v381_v30, %v373_v36  ;;  %v480_v9 = vadd.f32 %v476_v40, %v467_v53  ;;  %v577_v12 = vadd.f32 %v573_v41, %v564_v54 }
  0xa8   : > { %v316_v37 = vpop.xlane.xlu1 %315  ;;  %v374_v43 = vmul.f32 %v370_v28, %v1173_v27  ;;  %v468_v47 = vmul.f32 %v937_v29, %v1173_v27  ;;  %v565_v55 = vmul.f32 %v958_v38, %v1173_v27  ;;  %v566_v28 = vmul.f32 %v959_v8, %v1154_v18 }
  0xa9   : > { %v1201_v42 = vmul.f32 0.00390625, %v316_v37  ;;  %v326_v44 = vpop.xlane.xlu0 %325  ;;  %v390_v24 = vsel %vm389_vm0, %v385_v52, 0.0  ;;  %v581_v37 = vsel %vm389_vm0, %v577_v12, 0.0 }
  0xaa   : > { %v382_v48 = vmul.f32 %v378_v31, %v326_v44  ;;  %v477_v49 = vmul.f32 %v941_v32, %v326_v44  ;;  %v574_v50 = vmul.f32 %v962_v33, %v326_v44  ;;  %v484_v33 = vsel %vm389_vm0, %v480_v9, 0.0 }
  0xab   : > { %v376_v61 = vmul.f32 %v372_v45, %v1201_v42  ;;  %v470_v20 = vmul.f32 %v939_v56, %v1201_v42  ;;  %v567_v25 = vmul.f32 %v960_v62, %v1201_v42 }
  0xac   : > { %v386_v59 = vadd.f32 %v382_v48, %v374_v43  ;;  %v481_v60 = vadd.f32 %v477_v49, %v468_v47  ;;  %v332_v3 = vpop.xlane.xlu1 %331  ;;  %v578_v13 = vadd.f32 %v574_v50, %v565_v55 }
  0xad   : > { %v384_v14 = vmul.f32 %v380_v51, %v332_v3  ;;  %v329_v16 = vpop.xlane.xlu0 %328  ;;  %v479_v21 = vmul.f32 %v943_v57, %v332_v3  ;;  %v576_v26 = vmul.f32 %v964_v63, %v332_v3  ;;  %v410_v63 = vlaneseq }
  0xae   : > { %v391_v17 = vsel %vm389_vm0, %v386_v59, 0.0  ;;  %v383_v23 = vmul.f32 %v379_v58, %v329_v16  ;;  %v485_v29 = vsel %vm389_vm0, %v481_v60, 0.0  ;;  %v478_v32 = vmul.f32 %v942_v15, %v329_v16 }
  0xaf   : > { %v388_v30 = vadd.f32 %v384_v14, %v376_v61  ;;  %v392_v34 = vadd.f32 %v391_v17, %v390_v24  ;;  %v582_v35 = vsel %vm389_vm0, %v578_v13, 0.0  ;;  %v575_v36 = vmul.f32 %v963_v22, %v329_v16  ;;  %v403_v16 = vld [vmem:[%s1488_s4] sm:$0x1]  ;;  %v965_v24 = vld [vmem:[%s1488_s4 + $0x2] sm:$0x1] }
  0xb0   : > { %v387_v31 = vadd.f32 %v383_v23, %v375_v39  ;;  %v483_v38 = vadd.f32 %v479_v21, %v470_v20  ;;  %v482_v41 = vadd.f32 %v478_v32, %v469_v7  ;;  %v486_v43 = vadd.f32 %v485_v29, %v484_v33  ;;  %v406_v29 = vld [vmem:[%s1489_s5] sm:$0xff]  ;;  %v409_v33 = vld [vmem:[%s1489_s5 + $0x18] sm:$0xff] }
  0xb1   : > { %v580_v44 = vadd.f32 %v576_v26, %v567_v25  ;;  %v579_v46 = vadd.f32 %v575_v36, %v566_v28  ;;  %v583_v47 = vadd.f32 %v582_v35, %v581_v37  ;;  %v395_v39 = vsel %vm389_vm0, %v388_v30, 0.0  ;;  %v407_v28 = vld [vmem:[%s1489_s5 + $0x8] sm:$0xff]  ;;  %v408_v35 = vld [vmem:[%s1489_s5 + $0x10] sm:$0xff] }
  0xb2   : > { %v393_v40 = vsel %vm389_vm0, %v387_v31, 0.0  ;;  %v487_v48 = vsel %vm389_vm0, %v482_v41, 0.0  ;;  %v489_v52 = vsel %vm389_vm0, %v483_v38, 0.0  ;;  %v1258_v14 = vshrl.u32 %v410_v63, 7 }
  0xb3   : > { %v394_v45 = vadd.f32 %v393_v40, %v392_v34  ;;  %v488_v50 = vadd.f32 %v487_v48, %v486_v43  ;;  %v584_v51 = vsel %vm389_vm0, %v579_v46, 0.0  ;;  %v586_v54 = vsel %vm389_vm0, %v580_v44, 0.0  ;;  %v944_v34 = vld [vmem:[%s1488_s4 + $0x1] sm:$0x1] }
  0xb4   : > { %v585_v53 = vadd.f32 %v584_v51, %v583_v47  ;;  %v1264_v23 = vsub.s32 0, %v1258_v14  ;;  %v967_v47 = vld [vmem:[%s1489_s5 + $0x48] sm:$0xff] }
  0xb5   : > { %v396_v49 = vadd.f32 %v395_v39, %v394_v45  ;;  %v490_v56 = vadd.f32 %v489_v52, %v488_v50  ;;  %v966_v39 = vld [vmem:[%s1489_s5 + $0x40] sm:$0xff] }
  0xb6   : > { %v587_v57 = vadd.f32 %v586_v54, %v585_v53  ;;  %v969_v53 = vld [vmem:[%s1489_s5 + $0x58] sm:$0xff]  ;;  %v968_v54 = vld [vmem:[%s1489_s5 + $0x50] sm:$0xff] }
  0xb7   : > { %v397_v55 = vrot.slane %v396_v49, 4  ;;  %v491_v59 = vrot.slane %v490_v56, 4 }
  0xb8   : > { %v588_v60 = vrot.slane %v587_v57, 4 }
  0xb9   : > { %v398_v58 = vadd.f32 %v397_v55, %v396_v49  ;;  %v492_v62 = vadd.f32 %v491_v59, %v490_v56 }
  0xba   : > { %v589_v3 = vadd.f32 %v588_v60, %v587_v57  ;;  %v946_v60 = vld [vmem:[%s1489_s5 + $0x28] sm:$0xff] }
  0xbb   : > { %v399_v61 = vrot.slane %v398_v58, 2  ;;  %v493_v8 = vrot.slane %v492_v62, 2 }
  0xbc   : > { %v590_v9 = vrot.slane %v589_v3, 2 }
  0xbd   : > { %v400_v7 = vadd.f32 %v399_v61, %v398_v58  ;;  %v494_v13 = vadd.f32 %v493_v8, %v492_v62  ;;  %v945_v61 = vld [vmem:[%s1489_s5 + $0x20] sm:$0xff]  ;;  %v948_v8 = vld [vmem:[%s1489_s5 + $0x38] sm:$0xff] }
  0xbe   : > { %v591_v15 = vadd.f32 %v590_v9, %v589_v3  ;;  %v947_v9 = vld [vmem:[%s1489_s5 + $0x30] sm:$0xff] }
  0xbf   : > { %v401_v12 = vrot.slane %v400_v7, 1  ;;  %v495_v20 = vrot.slane %v494_v13, 1 }
  0xc0   : > { %v592_v21 = vrot.slane %v591_v15, 1 }
  0xc1   : > { %v402_v17 = vadd.f32 %v401_v12, %v400_v7  ;;  %v496_v31 = vadd.f32 %v495_v20, %v494_v13  ;;  %v333_v12 = vsub.f32 %v1126_v2, %v1156_v19  ;;  %v334_v13 = vsub.f32 %v1130_v4, %v1156_v19 }
  0xc2   : > { %v593_v25 = vadd.f32 %v592_v21, %v591_v15  ;;  %v335_v15 = vsub.f32 %v1132_v5, %v1173_v27 }
  0xc3   : > { %v404_v22 = vadd.f32 %v403_v16, %v402_v17  ;;  %v499_v41 = vadd.f32 %v944_v34, %v496_v31  ;;  %v336_v16 = vsub.f32 %v1134_v6, %v1173_v27  ;;  %v339_v31 = vsub.f32 %v1142_v10, %v1201_v42 }
  0xc4   : > { %v596_v30 = vadd.f32 %v965_v24, %v593_v25  ;;  %v341_v24 = vmul.f32 %v333_v12, %v333_v12  ;;  %v342_v25 = vmul.f32 %v334_v13, %v334_v13  ;;  %v972_v12 = vld [vmem:[%s1490_s6 + $0x50] sm:$0xff] }
  0xc5   : > { %v405_v26 = vmax.f32 %v404_v22, 0.0  ;;  %v500_v48 = vmax.f32 %v499_v41, 0.0 }
  0xc6   : > { %v597_v36 = vmax.f32 %v596_v30, 0.0  ;;  %v344_v30 = vmul.f32 %v336_v16, %v336_v16 }
  0xc7   : > { %v413_v32 = vrot.slane %v405_v26, %v1264_v23  ;;  %v509_v55 = vrot.slane %v500_v48, %v1264_v23  ;;  %v337_v26 = vsub.f32 %v1122_v0, %v1154_v18 }
  0xc8   : > { %v606_v46 = vrot.slane %v597_v36, %v1264_v23 }
  0xc9   : > { %v415_v37 = vmul.f32 %v413_v32, %v407_v28  ;;  %v414_v38 = vmul.f32 %v413_v32, %v406_v29  ;;  %v417_v40 = vmul.f32 %v413_v32, %v409_v33  ;;  %v416_v45 = vmul.f32 %v413_v32, %v408_v35 }
  0xca   : > { %v608_v51 = vmul.f32 %v967_v47, %v606_v46  ;;  %v607_v52 = vmul.f32 %v966_v39, %v606_v46  ;;  %v610_v58 = vmul.f32 %v969_v53, %v606_v46  ;;  %v609_v59 = vmul.f32 %v968_v54, %v606_v46  ;;  %v431_v46 = vld [vmem:[%s1490_s6 + $0x8] sm:$0xff]  ;;  %v430_v47 = vld [vmem:[%s1490_s6] sm:$0xff] }
  0xcb   : > { %v421_v43 = vsel %vm389_vm0, %v415_v37, 0.0  ;;  %v418_v44 = vsel %vm389_vm0, %v414_v38, 0.0  ;;  %v427_v49 = vsel %vm389_vm0, %v417_v40, 0.0  ;;  %v424_v50 = vsel %vm389_vm0, %v416_v45, 0.0 }
  0xcc   : > { %422 = vadd.xlane.f32.xlu1 %v421_v43  ;;  %419 = vadd.xlane.f32.xlu0 %v418_v44  ;;  %v614_v56 = vsel %vm389_vm0, %v608_v51, 0.0  ;;  %v611_v57 = vsel %vm389_vm0, %v607_v52, 0.0  ;;  %v620_v62 = vsel %vm389_vm0, %v610_v58, 0.0  ;;  %v617_v63 = vsel %vm389_vm0, %v609_v59, 0.0  ;;  %v433_v51 = vld [vmem:[%s1490_s6 + $0x18] sm:$0xff]  ;;  %v432_v52 = vld [vmem:[%s1490_s6 + $0x10] sm:$0xff] }
  0xcd   : > { %v511_v3 = vmul.f32 %v946_v60, %v509_v55  ;;  %v510_v7 = vmul.f32 %v945_v61, %v509_v55  ;;  %v513_v21 = vmul.f32 %v948_v8, %v509_v55  ;;  %v512_v22 = vmul.f32 %v947_v9, %v509_v55  ;;  %v971_v59 = vld [vmem:[%s1490_s6 + $0x48] sm:$0xff]  ;;  %v970_v60 = vld [vmem:[%s1490_s6 + $0x40] sm:$0xff]  ;;  %v973_v9 = vld [vmem:[%s1490_s6 + $0x58] sm:$0xff] }
  0xce   : > { %v338_v28 = vsub.f32 %v1124_v1, %v1154_v18  ;;  %v343_v29 = vmul.f32 %v335_v15, %v335_v15  ;;  %v340_v32 = vsub.f32 %v1144_v11, %v1201_v42  ;;  %v349_v35 = vadd.f32 %v342_v25, %v341_v24  ;;  %v949_v24 = vld [vmem:[%s1490_s6 + $0x20] sm:$0xff] }
  0xcf   : > { %v517_v17 = vsel %vm389_vm0, %v511_v3, 0.0  ;;  %v514_v20 = vsel %vm389_vm0, %v510_v7, 0.0  ;;  %v523_v33 = vsel %vm389_vm0, %v513_v21, 0.0  ;;  %v520_v34 = vsel %vm389_vm0, %v512_v22, 0.0  ;;  %v950_v22 = vld [vmem:[%s1490_s6 + $0x28] sm:$0xff] }
  0xd0   : > { %428 = vadd.xlane.f32.xlu1 %v427_v49  ;;  %425 = vadd.xlane.f32.xlu0 %v424_v50  ;;  %v345_v36 = vmul.f32 %v337_v26, %v337_v26  ;;  %v352_v37 = vadd.f32 %v344_v30, %v343_v29  ;;  %v347_v38 = vmul.f32 %v339_v31, %v339_v31  ;;  %v1065_v45 = vmov 0  }
  0xd1   : > { %v348_v40 = vmul.f32 %v340_v32, %v340_v32  ;;  %v346_v41 = vmul.f32 %v338_v28, %v338_v28  ;;  %992 = vset.pattern.permute.xlu0 %v1065_v45  ;;  %991 = vset.pattern.permute.xlu1 %v1065_v45 }
  0xd3   : > { %v358_v43 = vadd.f32 %v348_v40, %v347_v38  ;;  %v355_v44 = vadd.f32 %v346_v41, %v345_v36 }
  0xd4   : > { %615 = vadd.xlane.f32.xlu1 %v614_v56  ;;  %612 = vadd.xlane.f32.xlu0 %v611_v57 }
  0xd8   : > { %621 = vadd.xlane.f32.xlu1 %v620_v62  ;;  %618 = vadd.xlane.f32.xlu0 %v617_v63 }
  0xdc   : > { %518 = vadd.xlane.f32.xlu1 %v517_v17  ;;  %515 = vadd.xlane.f32.xlu0 %v514_v20 }
  0xe0   : > { %524 = vadd.xlane.f32.xlu1 %v523_v33  ;;  %521 = vadd.xlane.f32.xlu0 %v520_v34 }
  0xe4   : > { %353 = vadd.xlane.f32.xlu1 %v352_v37  ;;  %350 = vadd.xlane.f32.xlu0 %v349_v35 }
  0xe8   : > { %359 = vadd.xlane.f32.xlu1 %v358_v43  ;;  %356 = vadd.xlane.f32.xlu0 %v355_v44 }
 0x159   : > { %v423_v39 = vpop.xlane.xlu1 %422  ;;  %v420_v48 = vpop.xlane.xlu0 %419 }
 0x15a   : > { %v435_v49 = vadd.f32 %v431_v46, %v423_v39  ;;  %v434_v50 = vadd.f32 %v430_v47, %v420_v48  ;;  %v951_v46 = vld [vmem:[%s1490_s6 + $0x30] sm:$0xff] }
 0x15c   : > { %v933_v53 = vmul.f32 -1.442695, %v435_v49  ;;  %v932_v54 = vmul.f32 -1.442695, %v434_v50 }
 0x15d   : > { %v429_v55 = vpop.xlane.xlu1 %428  ;;  %v426_v56 = vpop.xlane.xlu0 %425 }
 0x15e   : > { %993 = vpow2.f32 %v933_v53  ;;  %v437_v57 = vadd.f32 %v433_v51, %v429_v55  ;;  %v436_v58 = vadd.f32 %v432_v52, %v426_v56  ;;  %v952_v53 = vld [vmem:[%s1490_s6 + $0x38] sm:$0xff] }
 0x15f   : > { %995 = vpow2.f32 %v932_v54 }
 0x160   : > { %v935_v61 = vmul.f32 -1.442695, %v437_v57  ;;  %v934_v62 = vmul.f32 -1.442695, %v436_v58 }
 0x161   : > { %v616_v63 = vpop.xlane.xlu1 %615  ;;  %v613_v3 = vpop.xlane.xlu0 %612 }
 0x162   : > { %997 = vpow2.f32 %v935_v61  ;;  %v629_v7 = vadd.f32 %v971_v59, %v616_v63  ;;  %v628_v8 = vadd.f32 %v970_v60, %v613_v3 }
 0x163   : > { %999 = vpow2.f32 %v934_v62 }
 0x164   : > { %v975_v13 = vmul.f32 -1.442695, %v629_v7  ;;  %v974_v15 = vmul.f32 -1.442695, %v628_v8 }
 0x165   : > { %v622_v16 = vpop.xlane.xlu1 %621  ;;  %v619_v17 = vpop.xlane.xlu0 %618 }
 0x166   : > { %1001 = vpow2.f32 %v975_v13  ;;  %v631_v20 = vadd.f32 %v973_v9, %v622_v16  ;;  %v630_v21 = vadd.f32 %v972_v12, %v619_v17 }
 0x167   : > { %1003 = vpow2.f32 %v974_v15 }
 0x168   : > { %v994_v25 = vpop.eup %993  ;;  %v977_v26 = vmul.f32 -1.442695, %v631_v20  ;;  %v976_v30 = vmul.f32 -1.442695, %v630_v21 }
 0x169   : > { %v996_v28 = vpop.eup %995  ;;  %v451_v29 = vadd.f32 1.0, %v994_v25  ;;  %v519_v31 = vpop.xlane.xlu1 %518 }
 0x16a   : > { %v516_v32 = vpop.xlane.xlu0 %515  ;;  %v450_v33 = vadd.f32 1.0, %v996_v28  ;;  %1005 = vpow2.f32 %v977_v26  ;;  %v532_v34 = vadd.f32 %v950_v22, %v519_v31 }
 0x16b   : > { %v531_v35 = vadd.f32 %v949_v24, %v516_v32  ;;  %1007 = vrcp.f32 %v451_v29 }
 0x16c   : > { %v998_v36 = vpop.eup %997  ;;  %1009 = vrcp.f32 %v450_v33  ;;  %v954_v37 = vmul.f32 -1.442695, %v532_v34 }
 0x16d   : > { %v1000_v38 = vpop.eup %999  ;;  %v453_v40 = vadd.f32 1.0, %v998_v36  ;;  %1011 = vpow2.f32 %v976_v30  ;;  %v953_v41 = vmul.f32 -1.442695, %v531_v35  ;;  %v525_v43 = vpop.xlane.xlu1 %524 }
 0x16e   : > { %v522_v44 = vpop.xlane.xlu0 %521  ;;  %v452_v45 = vadd.f32 1.0, %v1000_v38  ;;  %1013 = vpow2.f32 %v954_v37  ;;  %v534_v59 = vadd.f32 %v952_v53, %v525_v43 }
 0x16f   : > { %1015 = vrcp.f32 %v453_v40  ;;  %v533_v49 = vadd.f32 %v951_v46, %v522_v44 }
 0x170   : > { %v1002_v47 = vpop.eup %1001  ;;  %1017 = vrcp.f32 %v452_v45  ;;  %v956_v22 = vmul.f32 -1.442695, %v534_v59 }
 0x171   : > { %v1004_v39 = vpop.eup %1003  ;;  %v645_v48 = vadd.f32 1.0, %v1002_v47  ;;  %1019 = vpow2.f32 %v953_v41  ;;  %v354_v50 = vpop.xlane.xlu1 %353  ;;  %v955_v60 = vmul.f32 -1.442695, %v533_v49 }
 0x172   : > { %v351_v51 = vpop.xlane.xlu0 %350  ;;  %v644_v52 = vadd.f32 1.0, %v1004_v39  ;;  %v362_v54 = vmul.f32 0.003921569, %v354_v50 }
 0x173   : > { %1021 = vrcp.f32 %v645_v48  ;;  %v361_v55 = vmul.f32 0.003921569, %v351_v51 }
 0x174   : > { %v1006_v56 = vpop.eup %1005  ;;  %1023 = vrcp.f32 %v644_v52  ;;  %v366_v7 = vmax.f32 %v362_v54, 0.0 }
 0x175   : > { %v1375_v57 = vpop.eup %1007  ;;  %v647_v58 = vadd.f32 1.0, %v1006_v56  ;;  %v360_v61 = vpop.xlane.xlu1 %359  ;;  %v365_v13 = vmax.f32 %v361_v55, 0.0 }
 0x176   : > { %v357_v62 = vpop.xlane.xlu0 %356  ;;  %v1377_v63 = vpop.eup %1009  ;;  %v657_v3 = vmul.f32 %v1375_v57, %v1375_v57  ;;  %v364_v8 = vmul.f32 0.003921569, %v360_v61  ;;  %743 = vperm.xlu0 %992, %v1375_v57  }
 0x177   : > { %v1012_v9 = vpop.eup %1011  ;;  %1025 = vrcp.f32 %v647_v58  ;;  %v656_v12 = vmul.f32 %v1377_v63, %v1377_v63  ;;  %v363_v15 = vmul.f32 0.003921569, %v357_v62  ;;  %738 = vperm.xlu1 %991, %v1377_v63  }
 0x178   : > { %v1014_v16 = vpop.eup %1013  ;;  %v646_v17 = vadd.f32 1.0, %v1012_v9  ;;  %v661_v20 = vmul.f32 %v657_v3, %v366_v7  ;;  %1027 = vpow2.f32 %v955_v60  ;;  %v368_v29 = vmax.f32 %v364_v8, 0.0 }
 0x179   : > { %v1385_v21 = vpop.eup %1015  ;;  %v660_v24 = vmul.f32 %v656_v12, %v365_v13  ;;  %v367_v33 = vmax.f32 %v363_v15, 0.0  ;;  %v548_v34 = vadd.f32 1.0, %v1014_v16 }
 0x17a   : > { %v1387_v25 = vpop.eup %1017  ;;  %1029 = vrcp.f32 %v646_v17  ;;  %v1389_v26 = vadd.f32 1e-05, %v661_v20  ;;  %v659_v28 = vmul.f32 %v1385_v21, %v1385_v21 }
 0x17b   : > { %v1020_v30 = vpop.eup %1019  ;;  %v1393_v31 = vadd.f32 1e-05, %v660_v24  ;;  %v658_v32 = vmul.f32 %v1387_v25, %v1387_v25 }
 0x17c   : > { %1031 = vrsqrt.f32 %v1389_v26  ;;  %v663_v35 = vmul.f32 %v659_v28, %v368_v29  ;;  %v547_v37 = vadd.f32 1.0, %v1020_v30  ;;  %vm677_vm1 = vcmp.eq.f32.partialorder %v1389_v26, inf }
 0x17d   : > { %v1022_v36 = vpop.eup %1021  ;;  %1033 = vrsqrt.f32 %v1393_v31  ;;  %v662_v38 = vmul.f32 %v658_v32, %v367_v33  ;;  %vm670_vm2 = vcmp.eq.f32.partialorder %v1393_v31, inf  ;;  %v680_v20 = vand.u32 2147483648, %v1389_v26 }
 0x17e   : > { %v1024_v40 = vpop.eup %1023  ;;  %1035 = vpow2.f32 %v956_v22  ;;  %v697_v41 = vmul.f32 %v1022_v36, %v1022_v36  ;;  %v1399_v43 = vadd.f32 1e-05, %v663_v35  ;;  %vm679_vm3 = vcmp.eq.f32.partialorder %v1389_v26, 0.0 }
 0x17f   : > { %v696_v44 = vmul.f32 %v1024_v40, %v1024_v40  ;;  %v1401_v45 = vadd.f32 1e-05, %v662_v38  ;;  %1037 = vrcp.f32 %v548_v34  ;;  %vm672_vm4 = vcmp.eq.f32.partialorder %v1393_v31, 0.0 }
 0x180   : > { %v701_v46 = vmul.f32 %v697_v41, %v366_v7  ;;  %1039 = vrcp.f32 %v547_v37  ;;  %vm691_vm6 = vcmp.eq.f32.partialorder %v1399_v43, inf  ;;  %vm693_vm8 = vcmp.eq.f32.partialorder %v1399_v43, 0.0 }
 0x181   : > { %v1403_v47 = vpop.eup %1025  ;;  %v700_v39 = vmul.f32 %v696_v44, %v365_v13  ;;  %1041 = vrsqrt.f32 %v1399_v43  ;;  %vm684_vm5 = vcmp.eq.f32.partialorder %v1401_v45, inf  ;;  %vm686_vm7 = vcmp.eq.f32.partialorder %v1401_v45, 0.0 }
 0x182   : > { %v705_v48 = vadd.f32 1e-05, %v701_v46  ;;  %v699_v49 = vmul.f32 %v1403_v47, %v1403_v47  ;;  %v1028_v50 = vpop.eup %1027  ;;  %1043 = vrsqrt.f32 %v1401_v45 }
 0x183   : > { %v704_v51 = vadd.f32 1e-05, %v700_v39  ;;  %v549_v56 = vadd.f32 1.0, %v1028_v50 }
 0x184   : > { %v1030_v52 = vpop.eup %1029  ;;  %1045 = vrsqrt.f32 %v705_v48  ;;  %v703_v53 = vmul.f32 %v699_v49, %v368_v29  ;;  %v673_v29 = vand.u32 2147483648, %v1393_v31  ;;  %v687_v48 = vand.u32 2147483648, %v1401_v45 }
 0x185   : > { %1047 = vrsqrt.f32 %v704_v51  ;;  %v698_v54 = vmul.f32 %v1030_v52, %v1030_v52 }
 0x186   : > { %v1032_v55 = vpop.eup %1031  ;;  %v707_v58 = vadd.f32 1e-05, %v703_v53 }
 0x187   : > { %v1034_v59 = vpop.eup %1033  ;;  %v702_v60 = vmul.f32 %v698_v54, %v367_v33  ;;  %v676_v3 = vmul.f32 %v1032_v55, %v1389_v26  ;;  %v694_v54 = vand.u32 2147483648, %v1399_v43 }
 0x188   : > { %v1036_v61 = vpop.eup %1035  ;;  %1049 = vrsqrt.f32 %v707_v58  ;;  %v669_v8 = vmul.f32 %v1034_v59, %v1393_v31 }
 0x189   : > { %v706_v62 = vadd.f32 1e-05, %v702_v60  ;;  %v1038_v7 = vpop.eup %1037  ;;  %1051 = vrcp.f32 %v549_v56  ;;  %v550_v12 = vadd.f32 1.0, %v1036_v61  ;;  %v678_v16 = vsel %vm677_vm1, %v1389_v26, %v676_v3 }
 0x18a   : > { %v1040_v9 = vpop.eup %1039  ;;  %v671_v22 = vsel %vm670_vm2, %v1393_v31, %v669_v8  ;;  %v681_v30 = vsel %vm679_vm3, %v680_v20, %v678_v16  ;;  %v721_v35 = vsub.f32 %v1038_v7, %v1375_v57 }
 0x18b   : > { %1053 = vrsqrt.f32 %v706_v62  ;;  %v1042_v13 = vpop.eup %1041  ;;  %v674_v37 = vsel %vm672_vm4, %v673_v29, %v671_v22  ;;  %v720_v41 = vsub.f32 %v1040_v9, %v1377_v63 }
 0x18c   : > { %v1044_v15 = vpop.eup %1043  ;;  %1055 = vrcp.f32 %v550_v12  ;;  %v690_v44 = vmul.f32 %v1042_v13, %v1399_v43 }
 0x18d   : > { %v683_v33 = vmul.f32 %v1044_v15, %v1401_v45  ;;  %v304_v15 = vld [vmem:[%s290_s12] sm:$0x3] }
 0x18e   : > { %v1046_v17 = vpop.eup %1045  ;;  %v692_v50 = vsel %vm691_vm6, %v1399_v43, %v690_v44 }
 0x18f   : > { %v1048_v24 = vpop.eup %1047  ;;  %v713_v28 = vmul.f32 %v1046_v17, %v1022_v36  ;;  %v685_v31 = vsel %vm684_vm5, %v1401_v45, %v683_v33  ;;  %v695_v59 = vsel %vm693_vm8, %v694_v54, %v692_v50 }
 0x190   : > { %v712_v32 = vmul.f32 %v1048_v24, %v1024_v40  ;;  %v688_v53 = vsel %vm686_vm7, %v687_v48, %v685_v31 }
 0x191   : > { %v717_v34 = vmul.f32 %v713_v28, %v681_v30 }
 0x192   : > { %v716_v38 = vmul.f32 %v712_v32, %v674_v37  ;;  %v1050_v46 = vpop.eup %1049 }
 0x193   : > { %v725_v26 = vadd.f32 %v721_v35, %v717_v34  ;;  %v1052_v36 = vpop.eup %1051  ;;  %v715_v51 = vmul.f32 %v1050_v46, %v1403_v47  ;;  %v729_v3 = vsub.f32 %v1375_v57, %v717_v34 }
 0x194   : > { %v724_v39 = vadd.f32 %v720_v41, %v716_v38  ;;  %v722_v56 = vsub.f32 %v1052_v36, %v1387_v25  ;;  %v728_v47 = vsub.f32 %v1377_v63, %v716_v38 }
 0x195   : > { %v1054_v40 = vpop.eup %1053  ;;  %771 = vperm.xlu1 %991, %v725_v26   ;;  %v719_v61 = vmul.f32 %v715_v51, %v695_v59  ;;  %v733_v43 = vmul.f32 %v729_v3, %v1173_v27  ;;  %v827_v27 = vsub.s32 1, %v1258_v14 }
 0x196   : > { %766 = vperm.xlu0 %992, %v724_v39   ;;  %v714_v49 = vmul.f32 %v1054_v40, %v1030_v52  ;;  %v1056_v58 = vpop.eup %1055  ;;  %v732_v62 = vmul.f32 %v728_v47, %v1156_v19 }
 0x197   : > { %v723_v45 = vsub.f32 %v1056_v58, %v1385_v21  ;;  %v731_v9 = vsub.f32 %v1385_v21, %v719_v61  ;;  %v828_v17 = vrot.slane %v304_v15, %v827_v27 }
 0x198   : > { %v718_v55 = vmul.f32 %v714_v49, %v688_v53 }
 0x199   : > { %v727_v52 = vadd.f32 %v723_v45, %v719_v61  ;;  %v735_v12 = vmul.f32 %v731_v9, %v1201_v42 }
 0x19a   : > { %753 = vperm.xlu0 %992, %v1385_v21   ;;  %v726_v60 = vadd.f32 %v722_v56, %v718_v55  ;;  %v730_v7 = vsub.f32 %v1387_v25, %v718_v55 }
 0x19c   : > { %776 = vperm.xlu1 %991, %v726_v60   ;;  %v734_v8 = vmul.f32 %v730_v7, %v1154_v18 }
 0x1a0   : > { %781 = vperm.xlu1 %991, %v727_v52  }
 0x1a4   : > { %794 = vperm.xlu1 %991, %v732_v62  }
 0x1a8   : > { %799 = vperm.xlu1 %991, %v733_v43  }
 0x1ac   : > { %804 = vperm.xlu1 %991, %v734_v8  }
 0x1b0   : > { %809 = vperm.xlu1 %991, %v735_v12  }
 0x1b4   : > { %748 = vperm.xlu1 %991, %v1387_v25   ;;  %v824_v25 = vrot.slane %v304_v15, %v1264_v23 }
 0x1f5   : > { %v744_v57 = vpop.permute.xlu0 %743 }
 0x1f6   : > { %v739_v63 = vpop.permute.xlu1 %738  ;;  %v758_v37 = vmul.f32 %v744_v57, %v1132_v5  ;;  %v759_v38 = vmul.f32 %v744_v57, %v1134_v6 }
 0x1f7   : > { %v756_v28 = vmul.f32 %v739_v63, %v1126_v2  ;;  %v757_v29 = vmul.f32 %v739_v63, %v1130_v4 }
 0x214   : > { %v772_v19 = vpop.permute.xlu1 %771 }
 0x215   : > { %v767_v18 = vpop.permute.xlu0 %766  ;;  %v786_v14 = vmul.f32 %v772_v19, %v1132_v5  ;;  %v787_v30 = vmul.f32 %v772_v19, %v1134_v6 }
 0x216   : > { %v784_v42 = vmul.f32 %v767_v18, %v1126_v2  ;;  %v785_v16 = vmul.f32 %v767_v18, %v1130_v4 }
 0x219   : > { %v754_v5 = vpop.permute.xlu0 %753 }
 0x21a   : > { %v762_v54 = vmul.f32 %v754_v5, %v1142_v10  ;;  %v763_v55 = vmul.f32 %v754_v5, %v1144_v11 }
 0x21b   : > { %v777_v13 = vpop.permute.xlu1 %776 }
 0x21c   : > { %v788_v39 = vmul.f32 %v777_v13, %v1122_v0  ;;  %v789_v31 = vmul.f32 %v777_v13, %v1124_v1 }
 0x21f   : > { %v782_v21 = vpop.permute.xlu1 %781 }
 0x220   : > { %v790_v40 = vmul.f32 %v782_v21, %v1142_v10  ;;  %v791_v48 = vmul.f32 %v782_v21, %v1144_v11 }
 0x223   : > { %v795_v20 = vpop.permute.xlu1 %794 }
 0x224   : > { %v812_v22 = vadd.f32 %v795_v20, %v784_v42  ;;  %v813_v24 = vadd.f32 %v795_v20, %v785_v16 }
 0x226   : > { %v831_v32 = vmul.f32 %v824_v25, %v812_v22  ;;  %v832_v33 = vmul.f32 %v828_v17, %v813_v24 }
 0x227   : > { %v800_v23 = vpop.permute.xlu1 %799 }
 0x228   : > { %v839_v34 = vadd.f32 %v831_v32, %v756_v28  ;;  %v840_v35 = vadd.f32 %v832_v33, %v757_v29  ;;  %v814_v2 = vadd.f32 %v800_v23, %v786_v14  ;;  %v815_v4 = vadd.f32 %v800_v23, %v787_v30 }
 0x22a   : > { %847 = vst [vmem:[%s1461_s15] sm:$0xff] %v839_v34  ;;  %848 = vst [vmem:[%s1461_s15 + $0x8] sm:$0xff] %v840_v35  ;;  %v833_v41 = vmul.f32 %v824_v25, %v814_v2  ;;  %v834_v44 = vmul.f32 %v828_v17, %v815_v4 }
 0x22b   : > { %v805_v46 = vpop.permute.xlu1 %804 }
 0x22c   : > { %v841_v26 = vadd.f32 %v833_v41, %v758_v37  ;;  %v842_v36 = vadd.f32 %v834_v44, %v759_v38  ;;  %v816_v49 = vadd.f32 %v805_v46, %v788_v39  ;;  %v817_v6 = vadd.f32 %v805_v46, %v789_v31 }
 0x22e   : > { %849 = vst [vmem:[%s1461_s15 + $0x10] sm:$0xff] %v841_v26  ;;  %850 = vst [vmem:[%s1461_s15 + $0x18] sm:$0xff] %v842_v36  ;;  %v835_v59 = vmul.f32 %v824_v25, %v816_v49  ;;  %v836_v60 = vmul.f32 %v828_v17, %v817_v6 }
 0x22f   : > { %v810_v50 = vpop.permute.xlu1 %809 }
 0x230   : > { %v818_v51 = vadd.f32 %v810_v50, %v790_v40  ;;  %v819_v53 = vadd.f32 %v810_v50, %v791_v48 }
 0x232   : > { %v837_v56 = vmul.f32 %v824_v25, %v818_v51  ;;  %v838_v58 = vmul.f32 %v828_v17, %v819_v53 }
 0x233   : > { %v749_v61 = vpop.permute.xlu1 %748 }
 0x234   : > { %v845_v45 = vadd.f32 %v837_v56, %v762_v54  ;;  %v846_v52 = vadd.f32 %v838_v58, %v763_v55  ;;  %v760_v47 = vmul.f32 %v749_v61, %v1122_v0  ;;  %v761_v62 = vmul.f32 %v749_v61, %v1124_v1 }
 0x236   : > { %853 = vst [vmem:[%s1461_s15 + $0x30] sm:$0xff] %v845_v45  ;;  %854 = vst [vmem:[%s1461_s15 + $0x38] sm:$0xff] %v846_v52  ;;  %v843_v3 = vadd.f32 %v835_v59, %v760_v47  ;;  %v844_v43 = vadd.f32 %v836_v60, %v761_v62 }
 0x238   : > { %851 = vst [vmem:[%s1461_s15 + $0x20] sm:$0xff] %v843_v3  ;;  %852 = vst [vmem:[%s1461_s15 + $0x28] sm:$0xff] %v844_v43 }
 0x239 PF: > { %s17_s24 = sadd.s32 1, %s1063_s24  }
 0x23a   : > { %p14_p4 = scmp.ge.s32.totalorder %s17_s24, 4  }
 0x23c   :  { %16 = sbr.rel (!%p14_p4) target bundleno = 1 (0x1), region = 91 }

</bundles_post_ra>
